<compile_context>
chip_gen: v6e
topology: v6e:2x2x1
jax: 0.10.0
libtpu: 0.0.40
codegen_flags: <defaults>
</compile_context>

<pallas_src>
import functools
import math

import jax
import jax.numpy as jnp
from jax.experimental import pallas as pl
from jax.experimental.pallas import tpu as pltpu

_LANE = 128      # vreg lane width
_SUBLANE = 8     # vreg sublane count (f32)


def _round_up(x, m):
    return ((x + m - 1) // m) * m


def _mlp_kernel(x_ref, w1_ref, b1_ref, w2_ref, b2_ref, o_ref):
    # x arrives as f32 straight from HBM; cast to the compute dtype on the VPU
    # under the DMA (no separate wrapper cast pass over x).
    x = x_ref[...].astype(w1_ref.dtype)
    h = jnp.dot(x, w1_ref[...], preferred_element_type=jnp.float32)
    h = jnp.maximum(h + b1_ref[...], 0.0)          # f32 bias add + ReLU on the VPU
    h = h.astype(w2_ref.dtype)                     # back to compute dtype for 2nd MXU pass
    out = jnp.dot(h, w2_ref[...], preferred_element_type=jnp.float32)
    o_ref[...] = (out + b2_ref[...]).astype(o_ref.dtype)


def prepare_params(w1, b1, w2, b2, compute_dtype=jnp.bfloat16):
    """Pad / cast parameters ONCE; cache the result and reuse across forward calls.

    w1: (D_in, H)  (transposed vs. PyTorch),  b1: (H,)
    w2: (H, D_out) (transposed vs. PyTorch),  b2: (D_out,)
    """
    D_in, H = w1.shape
    D_out = w2.shape[1]
    # H is not padded: the hidden activation never touches HBM, so padding it only
    # adds zero-FLOPs and VMEM.  D_out IS padded to a full 128-lane width so the
    # output store is lane-dense (unmasked vst); padded columns are exact zeros.
    Dp = _round_up(D_out, _LANE)
    w1_p = w1.astype(compute_dtype)
    b1_p = b1.reshape(1, H).astype(jnp.float32)
    w2_p = jnp.zeros((H, Dp), compute_dtype).at[:, :D_out].set(w2.astype(compute_dtype))
    b2_p = jnp.zeros((1, Dp), jnp.float32).at[:, :D_out].set(
        b2.reshape(1, D_out).astype(jnp.float32))
    return w1_p, b1_p, w2_p, b2_p


@functools.partial(jax.jit, static_argnames=("d_out", "block_b"))
def discriminator_forward(x, w1_p, b1_p, w2_p, b2_p, *, d_out, block_b=1024):
    """Forward of Linear(D_in,H) -> ReLU -> Linear(H,D_out).

    x : (B, D_in) float32;  params from prepare_params().
    Returns (B, d_out) in the compute dtype (bf16 by default, f32 if prepared f32).
    """
    B, D_in = x.shape
    H = w1_p.shape[1]
    Dp = w2_p.shape[1]
    compute_dtype = w1_p.dtype
    out_dtype = compute_dtype          # bf16 output halves HBM writeback; f32 path keeps f32.

    # Batch tile: target a 2-step grid so v7x's two TensorCores both get work
    # (costs only one extra ~0.35us step on single-TC v5e/v6e), bounded by
    # block_b to cap VMEM for very large batches.  Ragged last block is handled
    # by Pallas -- no explicit padding copy of x.
    tb = max(_SUBLANE, min(block_b, _round_up(pl.cdiv(B, 2), _SUBLANE)))
    grid = (pl.cdiv(B, tb),)

    item_c = w1_p.dtype.itemsize
    out_item = jnp.dtype(out_dtype).itemsize
    flops = 2 * B * (D_in * H + H * Dp)
    bytes_accessed = (x.size * x.dtype.itemsize
                      + w1_p.size * item_c + w2_p.size * item_c
                      + (b1_p.size + b2_p.size) * 4
                      + B * Dp * out_item)
    # Explicit VMEM budget (important on v7x: 64 MiB physical, 32 MiB default scoped):
    # double-buffered x/out tiles + resident weights/biases, with 2x slack, >=16 MiB.
    vmem_need = 2 * (tb * D_in * x.dtype.itemsize
                     + tb * Dp * out_item
                     + w1_p.size * item_c + w2_p.size * item_c
                     + (b1_p.size + b2_p.size) * 4)
    vmem_limit = int(min(max(2 * vmem_need, 16 * 1024 * 1024), 64 * 1024 * 1024))

    out = pl.pallas_call(
        _mlp_kernel,
        out_shape=jax.ShapeDtypeStruct((B, Dp), out_dtype),
        grid_spec=pltpu.PrefetchScalarGridSpec(
            num_scalar_prefetch=0,
            grid=grid,
            in_specs=[
                pl.BlockSpec((tb, D_in), lambda i: (i, 0)),   # batch tile of x (f32 from HBM)
                # Constant-index weights/biases: VMEM-resident across all grid steps.
                # (At large H/D_out: add pipeline_mode=pl.Buffered(1) to single-buffer
                #  these, and split features onto an "arbitrary" grid axis for v7x VMEM.)
                pl.BlockSpec((D_in, H), lambda i: (0, 0)),
                pl.BlockSpec((1, H), lambda i: (0, 0)),
                pl.BlockSpec((H, Dp), lambda i: (0, 0)),
                pl.BlockSpec((1, Dp), lambda i: (0, 0)),
            ],
            out_specs=pl.BlockSpec((tb, Dp), lambda i: (i, 0)),
        ),
        compiler_params=pltpu.CompilerParams(
            dimension_semantics=("parallel",),
            vmem_limit_bytes=vmem_limit,
        ),
        cost_estimate=pl.CostEstimate(
            flops=flops, transcendentals=0, bytes_accessed=bytes_accessed),
    )(x, w1_p, b1_p, w2_p, b2_p)

    return out[:, :d_out]


def init_params(key, input_dim, hidden_dim, output_dim):
    """Deterministic init mimicking torch.nn.Linear defaults (uniform +/- 1/sqrt(fan_in))."""
    k1, k2, k3, k4 = jax.random.split(key, 4)
    bound1 = 1.0 / math.sqrt(input_dim)
    bound2 = 1.0 / math.sqrt(hidden_dim)
    w1 = jax.random.uniform(k1, (input_dim, hidden_dim), jnp.float32, -bound1, bound1)
    b1 = jax.random.uniform(k2, (hidden_dim,), jnp.float32, -bound1, bound1)
    w2 = jax.random.uniform(k3, (hidden_dim, output_dim), jnp.float32, -bound2, bound2)
    b2 = jax.random.uniform(k4, (output_dim,), jnp.float32, -bound2, bound2)
    return w1, b1, w2, b2


if __name__ == "__main__":
    # Small shapes consistent with the module.  B=256 with the 2-step-grid policy
    # gives tb=128 (exercises pipelining / the megacore path).
    B, D_IN, H, D_OUT = 256, 32, 64, 16
    key = jax.random.PRNGKey(0)
    kx, kp = jax.random.split(key)
    x = jax.random.normal(kx, (B, D_IN), jnp.float32)
    w1, b1, w2, b2 = init_params(kp, D_IN, H, D_OUT)

    # Pure-JAX reference (same semantics as the PyTorch forward), highest-precision matmuls.
    ref = jnp.maximum(
        jnp.dot(x, w1, precision=jax.lax.Precision.HIGHEST) + b1[None, :], 0.0)
    ref = jnp.dot(ref, w2, precision=jax.lax.Precision.HIGHEST) + b2[None, :]

    # 1) f32 compute path: tight tolerance.
    p_f32 = prepare_params(w1, b1, w2, b2, jnp.float32)
    out_f32 = jax.block_until_ready(discriminator_forward(x, *p_f32, d_out=D_OUT))
    assert out_f32.shape == (B, D_OUT)
    assert jnp.allclose(out_f32, ref, atol=1e-3, rtol=1e-3)

    # 2) Default bf16-input / f32-accumulate path (prepared params are reused across calls).
    p_bf16 = prepare_params(w1, b1, w2, b2, jnp.bfloat16)
    out_bf16 = jax.block_until_ready(discriminator_forward(x, *p_bf16, d_out=D_OUT))
    assert out_bf16.shape == (B, D_OUT)
    assert jnp.allclose(out_bf16.astype(jnp.float32), ref, atol=5e-2, rtol=5e-2)

    # 3) Ragged batch (B not a multiple of the tile): exercises Pallas' masked
    #    last-block handling with no explicit padding copy of x.
    Br = 200
    out_rag = jax.block_until_ready(discriminator_forward(x[:Br], *p_f32, d_out=D_OUT))
    assert out_rag.shape == (Br, D_OUT)
    assert jnp.allclose(out_rag, ref[:Br], atol=1e-3, rtol=1e-3)

    print("KERNEL_OK")
</pallas_src>

<mosaic_0001>
module attributes {stable_mosaic.version = 11 : i64} {
  func.func @_mlp_kernel(%arg0: i32, %arg1: memref<128x32xf32, #tpu.memory_space<vmem>>, %arg2: memref<32x64xf32, #tpu.memory_space<vmem>>, %arg3: memref<1x64xf32, #tpu.memory_space<vmem>>, %arg4: memref<64x128xf32, #tpu.memory_space<vmem>>, %arg5: memref<1x128xf32, #tpu.memory_space<vmem>>, %arg6: memref<128x128xf32, #tpu.memory_space<vmem>>) attributes {dimension_semantics = [#tpu.dimension_semantics<parallel>], iteration_bounds = array<i64: 2>, scalar_prefetch = 0 : i64, scratch_operands = 0 : i64, tpu.core_type = #tpu.core_type<tc>, window_params = [{transform_indices = @transform_0, window_bounds = array<i64: 128, 32>}, {pipeline_mode = #tpu.pipeline_mode<synchronous>, transform_indices = @transform_1, window_bounds = array<i64: 32, 64>}, {pipeline_mode = #tpu.pipeline_mode<synchronous>, transform_indices = @transform_2, window_bounds = array<i64: 1, 64>}, {pipeline_mode = #tpu.pipeline_mode<synchronous>, transform_indices = @transform_3, window_bounds = array<i64: 64, 128>}, {pipeline_mode = #tpu.pipeline_mode<synchronous>, transform_indices = @transform_4, window_bounds = array<i64: 1, 128>}, {transform_indices = @transform_5, window_bounds = array<i64: 128, 128>}]} {
    %c0 = arith.constant 0 : index
    %c0_0 = arith.constant 0 : index
    %0 = vector.load %arg1[%c0, %c0_0] : memref<128x32xf32, #tpu.memory_space<vmem>>, vector<128x32xf32>
    %c0_1 = arith.constant 0 : index
    %c0_2 = arith.constant 0 : index
    %1 = vector.load %arg2[%c0_1, %c0_2] : memref<32x64xf32, #tpu.memory_space<vmem>>, vector<32x64xf32>
    %cst = arith.constant dense<0.000000e+00> : vector<128x64xf32>
    %2 = tpu.matmul %0, %1, %cst {dimension_numbers = #tpu.dot_dimension_numbers<[1], [0], [0], [1], [0, 0, 1, 1], [], []>} : vector<128x32xf32>, vector<32x64xf32>, vector<128x64xf32> -> vector<128x64xf32>
    %c0_3 = arith.constant 0 : index
    %c0_4 = arith.constant 0 : index
    %3 = vector.load %arg3[%c0_3, %c0_4] : memref<1x64xf32, #tpu.memory_space<vmem>>, vector<1x64xf32>
    %4 = vector.broadcast %3 : vector<1x64xf32> to vector<128x64xf32>
    %5 = arith.addf %2, %4 : vector<128x64xf32>
    %cst_5 = arith.constant 0.000000e+00 : f32
    %6 = vector.broadcast %cst_5 : f32 to vector<128x64xf32>
    %7 = arith.maximumf %5, %6 : vector<128x64xf32>
    %c0_6 = arith.constant 0 : index
    %c0_7 = arith.constant 0 : index
    %8 = vector.load %arg4[%c0_6, %c0_7] : memref<64x128xf32, #tpu.memory_space<vmem>>, vector<64x128xf32>
    %cst_8 = arith.constant dense<0.000000e+00> : vector<128x128xf32>
    %9 = tpu.matmul %7, %8, %cst_8 {dimension_numbers = #tpu.dot_dimension_numbers<[1], [0], [0], [1], [0, 0, 1, 1], [], []>} : vector<128x64xf32>, vector<64x128xf32>, vector<128x128xf32> -> vector<128x128xf32>
    %c0_9 = arith.constant 0 : index
    %c0_10 = arith.constant 0 : index
    %10 = vector.load %arg5[%c0_9, %c0_10] : memref<1x128xf32, #tpu.memory_space<vmem>>, vector<1x128xf32>
    %11 = vector.broadcast %10 : vector<1x128xf32> to vector<128x128xf32>
    %12 = arith.addf %9, %11 : vector<128x128xf32>
    %c0_11 = arith.constant 0 : index
    %c0_12 = arith.constant 0 : index
    %13 = vector.load %arg6[%c0_11, %c0_12] : memref<128x128xf32, #tpu.memory_space<vmem>>, vector<128x128xf32>
    tpu.vector_store %arg6[%c0_11, %c0_12], %12 {strides = array<i32>} : memref<128x128xf32, #tpu.memory_space<vmem>>, vector<128x128xf32>,
    return
  }
  func.func @transform_0(%arg0: i32) -> (i32, i32) {
    %c0_i32 = arith.constant 0 : i32
    %c0_i32_0 = arith.constant 0 : i32
    return %arg0, %c0_i32 : i32, i32
  }
  func.func @transform_1(%arg0: i32) -> (i32, i32) {
    %c0_i32 = arith.constant 0 : i32
    %c0_i32_0 = arith.constant 0 : i32
    %c0_i32_1 = arith.constant 0 : i32
    return %c0_i32, %c0_i32_0 : i32, i32
  }
  func.func @transform_2(%arg0: i32) -> (i32, i32) {
    %c0_i32 = arith.constant 0 : i32
    %c0_i32_0 = arith.constant 0 : i32
    %c0_i32_1 = arith.constant 0 : i32
    return %c0_i32, %c0_i32_0 : i32, i32
  }
  func.func @transform_3(%arg0: i32) -> (i32, i32) {
    %c0_i32 = arith.constant 0 : i32
    %c0_i32_0 = arith.constant 0 : i32
    %c0_i32_1 = arith.constant 0 : i32
    return %c0_i32, %c0_i32_0 : i32, i32
  }
  func.func @transform_4(%arg0: i32) -> (i32, i32) {
    %c0_i32 = arith.constant 0 : i32
    %c0_i32_0 = arith.constant 0 : i32
    %c0_i32_1 = arith.constant 0 : i32
    return %c0_i32, %c0_i32_0 : i32, i32
  }
  func.func @transform_5(%arg0: i32) -> (i32, i32) {
    %c0_i32 = arith.constant 0 : i32
    %c0_i32_0 = arith.constant 0 : i32
    return %arg0, %c0_i32 : i32, i32
  }
}

</mosaic_0001>

<bundles_post_ra>
// kernel: discriminator_forward.1
= control target key start
LH: loop header
LB: loop body
LE: loop exit
PB: predicated region body
PF: predicated region fallthrough
CT: control target
= control target key end

     0   :  { %s969_s18 = smov 0   ;;  %s1103_s0 = inlined_call_operand.vmem [shape: f32[256,32], index: 0, kind: input, shape index: {}]   ;;  %s1104_s1 = inlined_call_operand.vmem [shape: f32[32,64], index: 1, kind: input, shape index: {}]   ;;  %s1105_s2 = inlined_call_operand.vmem [shape: f32[1,64], index: 2, kind: input, shape index: {}]   ;;  %s1106_s3 = inlined_call_operand.vmem [shape: f32[64,128], index: 3, kind: input, shape index: {}]   ;;  %s1107_s4 = inlined_call_operand.vmem [shape: f32[1,128], index: 4, kind: input, shape index: {}]   ;;  %s1108_s5 = inlined_call_operand.vmem [shape: f32[256,128], index: 5, kind: output, shape index: {}]  }
   0x1 LB: > { %s746_s19 = sadd.s32 4294967295, %s937_s18   ;;  %p750_p0 = scmp.ge.s32.totalorder %s937_s18, 1  ;;  %s937_s18 = sphi %s969_s18, %s15_s18  }
   0x2   : > { %p188_p1 = scmp.lt.s32.totalorder %s937_s18, 3 }
   0x4   : > { %p189_p2 = pnand %p750_p0, %p188_p1 }
   0x5   : > { %s751_s24 = sshll.u32 (!%p189_p2), %s746_s19, 4 }
   0x6   : > { %192 = sbr.rel (%p189_p2) target bundleno = 446 (0x1be), region = 40  ;;  %p217_p3 = scmp.lt.s32.totalorder (!%p189_p2), %s751_s24, 31 }
   0xb   : > { %v247_v0 = vld [vmem:[%s1104_s1 + $0x18] sm:$0xff]  ;;  %v246_v1 = vld [vmem:[%s1104_s1 + $0x10] sm:$0xff]  ;;  %v245_v3 = vld [vmem:[%s1104_s1 + $0x8] sm:$0xff]  ;;  %s1110_s24 = smov (!%p217_p3, %s751_s24), 31  ;;  %vm255_vm0 = vcmask 261120   ;;  %vm480_vm1 = vcmask 523264  }
   0xc   : > { %835 = vmatprep.subr.mxu0 %v247_v0  ;;  %v472_v2 = vld [vmem:[%s1106_s3 + $0x38] sm:$0xff]  ;;  %v471_v4 = vld [vmem:[%s1106_s3 + $0x30] sm:$0xff]  ;;  %v244_v5 = vld [vmem:[%s1104_s1] sm:$0xff]  ;;  %s752_s8 = sshll.u32 %s1110_s24, 3 }
   0xd   : > { %836 = vmatpush3.msra.mxu0 %v247_v0  ;;  %907 = vmatprep.subr.mxu1 %v472_v2  ;;  %v470_v6 = vld [vmem:[%s1106_s3 + $0x28] sm:$0xff]  ;;  %s1006_s13 = scalar_lea.vmem %s1103_s0, %s752_s8  ;;  %v469_v11 = vld [vmem:[%s1106_s3 + $0x20] sm:$0xff]  ;;  %v468_v24 = vld [vmem:[%s1106_s3 + $0x18] sm:$0xff]  ;;  %s1082_s7 = scalar_lea.vmem %s1108_s5, %s752_s8 }
   0xe   : > { %837 = vmatprep.subr.mxu0 %v246_v1  ;;  %915 = vmatpush3.msra.mxu1 %v472_v2  ;;  %v228_v7 = vld [vmem:[%s1006_s13] sm:$0xff]  ;;  %v229_v8 = vld [vmem:[%s1006_s13 + $0x8] sm:$0xff]  ;;  %v230_v9 = vld [vmem:[%s1006_s13 + $0x10] sm:$0xff] }
   0xf   : > { %838 = vmatpush3.msra.mxu0 %v246_v1  ;;  %908 = vmatprep.subr.mxu1 %v471_v4  ;;  %v231_v10 = vld [vmem:[%s1006_s13 + $0x18] sm:$0xff]  ;;  %v232_v12 = vld [vmem:[%s1006_s13 + $0x20] sm:$0xff]  ;;  %v233_v13 = vld [vmem:[%s1006_s13 + $0x28] sm:$0xff] }
  0x10   : > { %839 = vmatprep.subr.mxu0 %v245_v3  ;;  %916 = vmatpush3.msra.mxu1 %v471_v4  ;;  %v234_v14 = vld [vmem:[%s1006_s13 + $0x30] sm:$0xff]  ;;  %v235_v15 = vld [vmem:[%s1006_s13 + $0x38] sm:$0xff]  ;;  %v236_v16 = vld [vmem:[%s1006_s13 + $0x40] sm:$0xff] }
  0x11   : > { %840 = vmatpush3.msra.mxu0 %v245_v3  ;;  %909 = vmatprep.subr.mxu1 %v470_v6  ;;  %v237_v17 = vld [vmem:[%s1006_s13 + $0x48] sm:$0xff]  ;;  %v238_v18 = vld [vmem:[%s1006_s13 + $0x50] sm:$0xff]  ;;  %v239_v19 = vld [vmem:[%s1006_s13 + $0x58] sm:$0xff] }
  0x12   : > { %841 = vmatprep.subr.mxu0 %v244_v5  ;;  %917 = vmatpush3.msra.mxu1 %v470_v6  ;;  %v240_v20 = vld [vmem:[%s1006_s13 + $0x60] sm:$0xff]  ;;  %v241_v21 = vld [vmem:[%s1006_s13 + $0x68] sm:$0xff]  ;;  %v242_v22 = vld [vmem:[%s1006_s13 + $0x70] sm:$0xff] }
  0x13   : > { %842 = vmatpush3.msra.mxu0 %v244_v5  ;;  %843 = vmatprep.mubr.msk.f32.mxu0 %vm255_vm0, %v228_v7  ;;  %v243_v23 = vld [vmem:[%s1006_s13 + $0x78] sm:$0xff]  ;;  %v467_v25 = vld [vmem:[%s1106_s3 + $0x10] sm:$0xff]  ;;  %v466_v26 = vld [vmem:[%s1106_s3 + $0x8] sm:$0xff] }
  0x14   : > { %844 = vmatmul.mubr.msk.f32.vlgmr.msra.gmra.mxu0 %vm255_vm0, %v229_v8  ;;  %867 = vmatprep.subr.mxu0 %v472_v2  ;;  %v465_v27 = vld [vmem:[%s1106_s3] sm:$0xff] }
  0x15   : > { %846 = vmatprep.mubr.msk.f32.mxu0 %vm255_vm0, %v230_v9  ;;  %868 = vmatpush3.msra.mxu0 %v472_v2  ;;  %v755_v28 = vld [vmem:[%s1105_s2] ss:$0 sm:$0xff] }
  0x16   : > { %869 = vmatprep.subr.mxu0 %v471_v4  ;;  %910 = vmatprep.subr.mxu1 %v469_v11 }
  0x17   : > { %870 = vmatpush3.msra.mxu0 %v471_v4  ;;  %918 = vmatpush3.msra.mxu1 %v469_v11 }
  0x18   : > { %847 = vmatmul.mubr.msk.f32.gmra.mxu0 %vm255_vm0, %v231_v10  ;;  %871 = vmatprep.subr.mxu0 %v470_v6 }
  0x19   : > { %849 = vmatprep.mubr.msk.f32.mxu0 %vm255_vm0, %v232_v12  ;;  %872 = vmatpush3.msra.mxu0 %v470_v6 }
  0x1a   : > { %873 = vmatprep.subr.mxu0 %v469_v11  ;;  %911 = vmatprep.subr.mxu1 %v468_v24 }
  0x1b   : > { %874 = vmatpush3.msra.mxu0 %v469_v11  ;;  %919 = vmatpush3.msra.mxu1 %v468_v24 }
  0x1c   : > { %850 = vmatmul.mubr.msk.f32.gmra.mxu0 %vm255_vm0, %v233_v13  ;;  %875 = vmatprep.subr.mxu0 %v468_v24  ;;  %v772_v13 = vld [vmem:[%s1107_s4] ss:$0 sm:$0xff] }
  0x1d   : > { %852 = vmatprep.mubr.msk.f32.mxu0 %vm255_vm0, %v234_v14  ;;  %876 = vmatpush3.msra.mxu0 %v468_v24 }
  0x1e   : > { %877 = vmatprep.subr.mxu0 %v467_v25  ;;  %912 = vmatprep.subr.mxu1 %v467_v25 }
  0x1f   : > { %878 = vmatpush3.msra.mxu0 %v467_v25  ;;  %920 = vmatpush3.msra.mxu1 %v467_v25 }
  0x20   : > { %853 = vmatmul.mubr.msk.f32.gmra.mxu0 %vm255_vm0, %v235_v15  ;;  %879 = vmatprep.subr.mxu0 %v466_v26 }
  0x21   : > { %855 = vmatprep.mubr.msk.f32.mxu0 %vm255_vm0, %v236_v16  ;;  %913 = vmatprep.subr.mxu1 %v466_v26 }
  0x22   : > { %880 = vmatpush3.msra.mxu0 %v466_v26  ;;  %921 = vmatpush3.msra.mxu1 %v466_v26 }
  0x23   : > { %881 = vmatprep.subr.mxu0 %v465_v27  ;;  %914 = vmatprep.subr.mxu1 %v465_v27 }
  0x24   : > { %856 = vmatmul.mubr.msk.f32.gmra.mxu0 %vm255_vm0, %v237_v17  ;;  %922 = vmatpush3.msra.mxu1 %v465_v27 }
  0x25   : > { %858 = vmatprep.mubr.msk.f32.mxu0 %vm255_vm0, %v238_v18  ;;  %882 = vmatpush3.msra.mxu0 %v465_v27 }
  0x28   : > { %859 = vmatmul.mubr.msk.f32.gmra.mxu0 %vm255_vm0, %v239_v19 }
  0x29   : > { %861 = vmatprep.mubr.msk.f32.mxu0 %vm255_vm0, %v240_v20 }
  0x2c   : > { %862 = vmatmul.mubr.msk.f32.gmra.mxu0 %vm255_vm0, %v241_v21 }
  0x2d   : > { %864 = vmatprep.mubr.msk.f32.mxu0 %vm255_vm0, %v242_v22 }
  0x30   : > { %865 = vmatmul.mubr.msk.f32.gmra.mxu0 %vm255_vm0, %v243_v23 }
  0xd4   : > { %v845_v29 = vpop.f32.mrf.mxu0 }
  0xd5   : > { %v376_v30 = vadd.f32 %v845_v29, %v755_v28 }
  0xd6   : > { %v370_v31 = vpop.f32.mrf.mxu0 }
  0xd7   : > { %v371_v32 = vadd.f32 %v755_v28, %v370_v31  ;;  %v450_v35 = vmax.f32 %v376_v30, 0.0 }
  0xd8   : > { %v848_v33 = vpop.f32.mrf.mxu0 }
  0xd9   : > { %v449_v34 = vmax.f32 %v371_v32, 0.0  ;;  %v386_v36 = vadd.f32 %v848_v33, %v755_v28 }
  0xda   : > { %v380_v37 = vpop.f32.mrf.mxu0 }
  0xdb   : > { %v381_v38 = vadd.f32 %v755_v28, %v380_v37  ;;  %883 = vmatprep.mubr.msk.f32.mxu0 %vm480_vm1, %v449_v34  ;;  %v452_v41 = vmax.f32 %v386_v36, 0.0 }
  0xdc   : > { %v851_v39 = vpop.f32.mrf.mxu0  ;;  %884 = vmatmul.mubr.msk.f32.vlgmr.msra.gmra.mxu0 %vm480_vm1, %v450_v35 }
  0xdd   : > { %v451_v40 = vmax.f32 %v381_v38, 0.0  ;;  %v396_v42 = vadd.f32 %v851_v39, %v755_v28 }
  0xde   : > { %v390_v43 = vpop.f32.mrf.mxu0 }
  0xdf   : > { %v391_v44 = vadd.f32 %v755_v28, %v390_v43  ;;  %886 = vmatprep.mubr.msk.f32.mxu1 %vm480_vm1, %v451_v40  ;;  %v454_v47 = vmax.f32 %v396_v42, 0.0 }
  0xe0   : > { %v854_v45 = vpop.f32.mrf.mxu0  ;;  %887 = vmatmul.mubr.msk.f32.vlgmr.msra.gmra.mxu1 %vm480_vm1, %v452_v41 }
  0xe1   : > { %v453_v46 = vmax.f32 %v391_v44, 0.0  ;;  %v406_v48 = vadd.f32 %v854_v45, %v755_v28 }
  0xe2   : > { %v400_v49 = vpop.f32.mrf.mxu0 }
  0xe3   : > { %v401_v50 = vadd.f32 %v755_v28, %v400_v49  ;;  %889 = vmatprep.mubr.msk.f32.mxu1 %vm480_vm1, %v453_v46  ;;  %v456_v53 = vmax.f32 %v406_v48, 0.0 }
  0xe4   : > { %v857_v51 = vpop.f32.mrf.mxu0  ;;  %890 = vmatmul.mubr.msk.f32.gmra.mxu1 %vm480_vm1, %v454_v47 }
  0xe5   : > { %v455_v52 = vmax.f32 %v401_v50, 0.0  ;;  %v416_v54 = vadd.f32 %v857_v51, %v755_v28 }
  0xe6   : > { %v410_v55 = vpop.f32.mrf.mxu0 }
  0xe7   : > { %v411_v56 = vadd.f32 %v755_v28, %v410_v55  ;;  %892 = vmatprep.mubr.msk.f32.mxu1 %vm480_vm1, %v455_v52  ;;  %v458_v59 = vmax.f32 %v416_v54, 0.0 }
  0xe8   : > { %v860_v57 = vpop.f32.mrf.mxu0  ;;  %893 = vmatmul.mubr.msk.f32.gmra.mxu1 %vm480_vm1, %v456_v53 }
  0xe9   : > { %v457_v58 = vmax.f32 %v411_v56, 0.0  ;;  %v426_v60 = vadd.f32 %v860_v57, %v755_v28 }
  0xea   : > { %v420_v61 = vpop.f32.mrf.mxu0 }
  0xeb   : > { %v421_v62 = vadd.f32 %v755_v28, %v420_v61  ;;  %895 = vmatprep.mubr.msk.f32.mxu1 %vm480_vm1, %v457_v58  ;;  %v460_v1 = vmax.f32 %v426_v60, 0.0 }
  0xec   : > { %v863_v63 = vpop.f32.mrf.mxu0  ;;  %896 = vmatmul.mubr.msk.f32.gmra.mxu1 %vm480_vm1, %v458_v59 }
  0xed   : > { %v459_v0 = vmax.f32 %v421_v62, 0.0  ;;  %v436_v2 = vadd.f32 %v863_v63, %v755_v28 }
  0xee   : > { %v430_v3 = vpop.f32.mrf.mxu0 }
  0xef   : > { %v431_v4 = vadd.f32 %v755_v28, %v430_v3  ;;  %898 = vmatprep.mubr.msk.f32.mxu1 %vm480_vm1, %v459_v0  ;;  %v462_v7 = vmax.f32 %v436_v2, 0.0 }
  0xf0   : > { %v866_v5 = vpop.f32.mrf.mxu0  ;;  %899 = vmatmul.mubr.msk.f32.gmra.mxu1 %vm480_vm1, %v460_v1 }
  0xf1   : > { %v461_v6 = vmax.f32 %v431_v4, 0.0  ;;  %v446_v8 = vadd.f32 %v866_v5, %v755_v28 }
  0xf2   : > { %v440_v9 = vpop.f32.mrf.mxu0 }
  0xf3   : > { %v441_v10 = vadd.f32 %v755_v28, %v440_v9  ;;  %901 = vmatprep.mubr.msk.f32.mxu1 %vm480_vm1, %v461_v6  ;;  %v464_v12 = vmax.f32 %v446_v8, 0.0 }
  0xf4   : > { %902 = vmatmul.mubr.msk.f32.gmra.mxu1 %vm480_vm1, %v462_v7 }
  0xf5   : > { %v463_v11 = vmax.f32 %v441_v10, 0.0 }
  0xf7   : > { %904 = vmatprep.mubr.msk.f32.mxu1 %vm480_vm1, %v463_v11 }
  0xf8   : > { %905 = vmatmul.mubr.msk.f32.gmra.mxu1 %vm480_vm1, %v464_v12 }
 0x19c   : > { %v885_v14 = vpop.f32.mrf.mxu0 }
 0x19d   : > { %v601_v15 = vadd.f32 %v885_v14, %v772_v13 }
 0x19e   : > { %v595_v16 = vpop.f32.mrf.mxu0 }
 0x19f   : > { %675 = vst [vmem:[%s1082_s7 + $0x8] sm:$0xff] %v601_v15  ;;  %v596_v17 = vadd.f32 %v772_v13, %v595_v16 }
 0x1a0   : > { %v888_v18 = vpop.f32.mrf.mxu1 }
 0x1a1   : > { %674 = vst [vmem:[%s1082_s7] sm:$0xff] %v596_v17  ;;  %v611_v19 = vadd.f32 %v888_v18, %v772_v13 }
 0x1a2   : > { %v605_v20 = vpop.f32.mrf.mxu1 }
 0x1a3   : > { %677 = vst [vmem:[%s1082_s7 + $0x18] sm:$0xff] %v611_v19  ;;  %v606_v21 = vadd.f32 %v772_v13, %v605_v20 }
 0x1a4   : > { %v891_v22 = vpop.f32.mrf.mxu1 }
 0x1a5   : > { %676 = vst [vmem:[%s1082_s7 + $0x10] sm:$0xff] %v606_v21  ;;  %v621_v23 = vadd.f32 %v891_v22, %v772_v13 }
 0x1a6   : > { %v615_v24 = vpop.f32.mrf.mxu1 }
 0x1a7   : > { %679 = vst [vmem:[%s1082_s7 + $0x28] sm:$0xff] %v621_v23  ;;  %v616_v25 = vadd.f32 %v772_v13, %v615_v24 }
 0x1a8   : > { %v894_v26 = vpop.f32.mrf.mxu1 }
 0x1a9   : > { %678 = vst [vmem:[%s1082_s7 + $0x20] sm:$0xff] %v616_v25  ;;  %v631_v27 = vadd.f32 %v894_v26, %v772_v13 }
 0x1aa   : > { %v625_v28 = vpop.f32.mrf.mxu1 }
 0x1ab   : > { %681 = vst [vmem:[%s1082_s7 + $0x38] sm:$0xff] %v631_v27  ;;  %v626_v29 = vadd.f32 %v772_v13, %v625_v28 }
 0x1ac   : > { %v897_v30 = vpop.f32.mrf.mxu1 }
 0x1ad   : > { %680 = vst [vmem:[%s1082_s7 + $0x30] sm:$0xff] %v626_v29  ;;  %v641_v31 = vadd.f32 %v897_v30, %v772_v13 }
 0x1ae   : > { %v635_v32 = vpop.f32.mrf.mxu1 }
 0x1af   : > { %683 = vst [vmem:[%s1082_s7 + $0x48] sm:$0xff] %v641_v31  ;;  %v636_v33 = vadd.f32 %v772_v13, %v635_v32 }
 0x1b0   : > { %v900_v34 = vpop.f32.mrf.mxu1 }
 0x1b1   : > { %682 = vst [vmem:[%s1082_s7 + $0x40] sm:$0xff] %v636_v33  ;;  %v651_v35 = vadd.f32 %v900_v34, %v772_v13 }
 0x1b2   : > { %v645_v36 = vpop.f32.mrf.mxu1 }
 0x1b3   : > { %685 = vst [vmem:[%s1082_s7 + $0x58] sm:$0xff] %v651_v35  ;;  %v646_v37 = vadd.f32 %v772_v13, %v645_v36 }
 0x1b4   : > { %v903_v38 = vpop.f32.mrf.mxu1 }
 0x1b5   : > { %684 = vst [vmem:[%s1082_s7 + $0x50] sm:$0xff] %v646_v37  ;;  %v661_v39 = vadd.f32 %v903_v38, %v772_v13 }
 0x1b6   : > { %v655_v40 = vpop.f32.mrf.mxu1 }
 0x1b7   : > { %687 = vst [vmem:[%s1082_s7 + $0x68] sm:$0xff] %v661_v39  ;;  %v656_v41 = vadd.f32 %v772_v13, %v655_v40 }
 0x1b8   : > { %v906_v42 = vpop.f32.mrf.mxu1 }
 0x1b9   : > { %686 = vst [vmem:[%s1082_s7 + $0x60] sm:$0xff] %v656_v41  ;;  %v671_v43 = vadd.f32 %v906_v42, %v772_v13 }
 0x1ba   : > { %v665_v44 = vpop.f32.mrf.mxu1 }
 0x1bb   : > { %689 = vst [vmem:[%s1082_s7 + $0x78] sm:$0xff] %v671_v43  ;;  %v666_v45 = vadd.f32 %v772_v13, %v665_v44 }
 0x1bd   : > { %688 = vst [vmem:[%s1082_s7 + $0x70] sm:$0xff] %v666_v45 }
 0x1be PF: > { %s15_s18 = sadd.s32 1, %s937_s18  }
 0x1bf   : > { %p12_p4 = scmp.ge.s32.totalorder %s15_s18, 4  }
 0x1c1   :  { %14 = sbr.rel (!%p12_p4) target bundleno = 1 (0x1), region = 70 }

</bundles_post_ra>
